<compile_context>
chip_gen: v5e
topology: v5e:2x2
jax: 0.10.0
libtpu: 0.0.40
codegen_flags: <defaults>
</compile_context>

<pallas_src>
import functools

import jax
import jax.numpy as jnp
import numpy as np
from jax.experimental import pallas as pl
from jax.experimental.pallas import tpu as pltpu


def _round_up(x: int, m: int) -> int:
    return ((x + m - 1) // m) * m


def _cdiv(a: int, b: int) -> int:
    return -(-a // b)


def _pad2(a, rows, cols):
    return jnp.pad(a, ((0, rows - a.shape[0]), (0, cols - a.shape[1])))


def _pick_row_tile(n: int, row_tile: int, row_align: int):
    """Aligned row tile <= row_tile with a nearly-full last tile; >=2 grid steps
    whenever possible so v7x megacore can split rows across its two TensorCores."""
    n_al = _round_up(max(n, 1), row_align)
    num_tiles = _cdiv(n_al, row_tile)
    if n_al >= 2 * row_align:
        num_tiles = max(num_tiles, 2)
    tm = _round_up(_cdiv(n_al, num_tiles), row_align)
    num_tiles = _cdiv(n_al, tm)
    return tm, num_tiles * tm


def _dlow_kernel(x_ref, w1_ref, b1_ref, w2_ref, b2_ref, wab_ref, bab_ref, out_ref):
    """Fused DLow q-net: tanh MLP + fused [q_A | q_b] head.

    Matmuls accumulate in f32 on the MXU; biases / elementwise math stay f32.
    The head result is stored directly as one wide, lane-dense, unmasked slab.
    """
    cd = w1_ref.dtype  # matmul compute dtype (f32 or bf16)
    h1 = jnp.tanh(
        jnp.dot(x_ref[...], w1_ref[...], preferred_element_type=jnp.float32)
        + b1_ref[...])
    h2 = jnp.tanh(
        jnp.dot(h1.astype(cd), w2_ref[...], preferred_element_type=jnp.float32)
        + b2_ref[...])
    out_ref[...] = (
        jnp.dot(h2.astype(cd), wab_ref[...], preferred_element_type=jnp.float32)
        + bab_ref[...])


def prepare_params(params, *, nk, nz, compute_dtype=jnp.bfloat16):
    """One-time weight preprocessing (pad to 128 multiples, fuse q_A|q_b, cast).

    Call once at parameter-load time; do NOT call per forward step.
    """
    d, h1 = params["w1"].shape
    h2 = params["w2"].shape[1]
    knz = nk * nz
    d_p, h1_p, h2_p, knz_p = (_round_up(v, 128) for v in (d, h1, h2, knz))
    cd = compute_dtype
    wab = jnp.concatenate(
        [_pad2(params["wa"], h2_p, knz_p), _pad2(params["wb"], h2_p, knz_p)],
        axis=1).astype(cd)
    bab = jnp.concatenate(
        [_pad2(params["ba"], 1, knz_p), _pad2(params["bb"], 1, knz_p)],
        axis=1).astype(jnp.float32)
    return {
        "w1": _pad2(params["w1"], d_p, h1_p).astype(cd),
        "b1": _pad2(params["b1"], 1, h1_p).astype(jnp.float32),
        "w2": _pad2(params["w2"], h1_p, h2_p).astype(cd),
        "b2": _pad2(params["b2"], 1, h2_p).astype(jnp.float32),
        "wab": wab,
        "bab": bab,
    }


def dlow_forward(agent_context, prep, eps, *, nk, nz, row_tile=512, mean=False):
    """DLow q-net forward via a single fused Pallas kernel.

    agent_context: [N, D] float32
    prep:          output of prepare_params() (padded / fused / cast weights)
    eps:           [1, nz] shared epsilon (share_eps=True); a [N*nk, nz] eps also
                   broadcasts correctly for the share_eps=False case.

    Returns (z, mu, logvar), each [N * nk, nz]  (matches PyTorch .view(-1, nz)).
    """
    n, d = agent_context.shape
    knz = nk * nz
    cd = prep["w1"].dtype
    d_p, h1_p = prep["w1"].shape
    h2_p = prep["w2"].shape[1]
    knz_p = prep["wab"].shape[1] // 2
    assert d <= d_p and knz <= knz_p, "prepare_params() built for different dims"

    # bf16 packs two rows per sublane -> align rows to 16 for fully packed x tiles.
    row_align = 16 if cd == jnp.bfloat16 else 8
    tm, n_p = _pick_row_tile(n, row_tile, row_align)

    # Only the activations are padded per call; all weight prep happened offline.
    x_p = _pad2(agent_context, n_p, d_p).astype(cd)

    inputs = (x_p, prep["w1"], prep["b1"], prep["w2"], prep["b2"],
              prep["wab"], prep["bab"])
    flops = 2 * n_p * (d_p * h1_p + h1_p * h2_p + h2_p * 2 * knz_p)
    transcendentals = n_p * (h1_p + h2_p)
    bytes_accessed = (sum(int(np.prod(a.shape)) * a.dtype.itemsize for a in inputs)
                      + n_p * 2 * knz_p * 4)

    pinned = lambda i: (0, 0)   # weights/biases stay VMEM-resident across row tiles

    ab = pl.pallas_call(
        _dlow_kernel,
        out_shape=jax.ShapeDtypeStruct((n_p, 2 * knz_p), jnp.float32),
        grid=(n_p // tm,),
        in_specs=[
            pl.BlockSpec((tm, d_p), lambda i: (i, 0)),       # activations: tiled rows
            pl.BlockSpec((d_p, h1_p), pinned),
            pl.BlockSpec((1, h1_p), pinned),
            pl.BlockSpec((h1_p, h2_p), pinned),
            pl.BlockSpec((1, h2_p), pinned),
            pl.BlockSpec((h2_p, 2 * knz_p), pinned),
            pl.BlockSpec((1, 2 * knz_p), pinned),
        ],
        out_specs=pl.BlockSpec((tm, 2 * knz_p), lambda i: (i, 0)),
        compiler_params=pltpu.CompilerParams(
            dimension_semantics=("parallel",)),
        cost_estimate=pl.CostEstimate(
            flops=flops,
            transcendentals=transcendentals,
            bytes_accessed=bytes_accessed),
    )(*inputs)

    # Tiny elementwise epilogue on the UNPADDED slices (PyTorch .view(-1, nz) layout).
    A = ab[:n, :knz].reshape(n * nk, nz)
    b = ab[:n, knz_p:knz_p + knz].reshape(n * nk, nz)
    z = b if mean else A * eps + b                 # eps [1,nz] broadcasts (share_eps)
    logvar = jnp.log(A * A + 1e-8)
    return z, b, logvar


def _reference_forward(agent_context, params, eps, *, nk, nz,
                       compute_dtype=jnp.float32):
    """Pure-jnp reference mirroring the PyTorch semantics (same matmul dtype)."""
    cd = compute_dtype
    f32 = jnp.float32
    x = agent_context.astype(cd)
    h1 = jnp.tanh(jnp.dot(x, params["w1"].astype(cd),
                          preferred_element_type=f32) + params["b1"])
    h2 = jnp.tanh(jnp.dot(h1.astype(cd), params["w2"].astype(cd),
                          preferred_element_type=f32) + params["b2"])
    A = (jnp.dot(h2.astype(cd), params["wa"].astype(cd),
                 preferred_element_type=f32) + params["ba"]).reshape(-1, nz)
    B = (jnp.dot(h2.astype(cd), params["wb"].astype(cd),
                 preferred_element_type=f32) + params["bb"]).reshape(-1, nz)
    eps_rep = jnp.repeat(eps, A.shape[0], axis=0)   # randn([1,nz]).repeat(N*nk, 1)
    z = A * eps_rep + B
    logvar = jnp.log(A ** 2 + 1e-8)
    return z, B, logvar


def init_params(key, pred_model_dim, qnet_mlp, nk, nz):
    """Deterministic synthetic parameter init (shapes match DLow.__init__)."""
    h1, h2 = qnet_mlp
    knz = nk * nz
    ks = jax.random.split(key, 8)

    def lin(kw, kb, fan_in, fan_out):
        bound = 1.0 / np.sqrt(fan_in)
        w = jax.random.uniform(kw, (fan_in, fan_out), jnp.float32, -bound, bound)
        b = jax.random.uniform(kb, (1, fan_out), jnp.float32, -bound, bound)
        return w, b

    w1, b1 = lin(ks[0], ks[1], pred_model_dim, h1)
    w2, b2 = lin(ks[2], ks[3], h1, h2)
    wa, ba = lin(ks[4], ks[5], h2, knz)
    wb, bb = lin(ks[6], ks[7], h2, knz)
    return {"w1": w1, "b1": b1, "w2": w2, "b2": b2,
            "wa": wa, "ba": ba, "wb": wb, "bb": bb}


if __name__ == "__main__":
    # Small shapes consistent with the module: agent_context is
    # [agent_num, pred_model_dim]; qnet_mlp hidden dims; nk samples of nz-dim z.
    agent_num = 8
    pred_model_dim = 32
    qnet_mlp = [64, 32]
    nk = 4
    nz = 8

    key = jax.random.PRNGKey(0)
    k_ctx, k_eps, k_par, k_ctx2 = jax.random.split(key, 4)

    agent_context = jax.random.normal(k_ctx, (agent_num, pred_model_dim), jnp.float32)
    eps = jax.random.normal(k_eps, (1, nz), jnp.float32)          # share_eps=True
    params = init_params(k_par, pred_model_dim, qnet_mlp, nk, nz)

    # --- f32 matmul path: strict check against the pure-jnp reference ---
    prep_f32 = prepare_params(params, nk=nk, nz=nz, compute_dtype=jnp.float32)
    fwd = jax.jit(functools.partial(dlow_forward, nk=nk, nz=nz))
    z, mu, logvar = fwd(agent_context, prep_f32, eps)
    jax.block_until_ready((z, mu, logvar))
    z_r, mu_r, lv_r = _reference_forward(
        agent_context, params, eps, nk=nk, nz=nz, compute_dtype=jnp.float32)
    np.testing.assert_allclose(np.asarray(z), np.asarray(z_r), rtol=1e-5, atol=1e-5)
    np.testing.assert_allclose(np.asarray(mu), np.asarray(mu_r), rtol=1e-5, atol=1e-5)
    np.testing.assert_allclose(np.asarray(logvar), np.asarray(lv_r), rtol=1e-5, atol=1e-5)

    # --- ragged N / multi-step grid: exercises tile rounding + >=2 "parallel" steps ---
    n2 = 22
    ctx2 = jax.random.normal(k_ctx2, (n2, pred_model_dim), jnp.float32)
    fwd_tiled = jax.jit(functools.partial(dlow_forward, nk=nk, nz=nz, row_tile=8))
    z2, mu2, lv2 = fwd_tiled(ctx2, prep_f32, eps)
    jax.block_until_ready((z2, mu2, lv2))
    z2_r, mu2_r, lv2_r = _reference_forward(
        ctx2, params, eps, nk=nk, nz=nz, compute_dtype=jnp.float32)
    np.testing.assert_allclose(np.asarray(z2), np.asarray(z2_r), rtol=1e-5, atol=1e-5)
    np.testing.assert_allclose(np.asarray(mu2), np.asarray(mu2_r), rtol=1e-5, atol=1e-5)
    np.testing.assert_allclose(np.asarray(lv2), np.asarray(lv2_r), rtol=1e-5, atol=1e-5)

    # --- bf16-weight path (MXU-friendly on v5e/v6e/v7x): compare vs bf16 reference ---
    prep_bf16 = prepare_params(params, nk=nk, nz=nz, compute_dtype=jnp.bfloat16)
    z16, mu16, lv16 = fwd(agent_context, prep_bf16, eps)
    jax.block_until_ready((z16, mu16, lv16))
    z_r16, mu_r16, lv_r16 = _reference_forward(
        agent_context, params, eps, nk=nk, nz=nz, compute_dtype=jnp.bfloat16)
    np.testing.assert_allclose(np.asarray(z16), np.asarray(z_r16), rtol=1e-2, atol=1e-2)
    np.testing.assert_allclose(np.asarray(mu16), np.asarray(mu_r16), rtol=1e-2, atol=1e-2)
    np.testing.assert_allclose(np.asarray(lv16), np.asarray(lv_r16), rtol=1e-2, atol=2e-2)

    print("KERNEL_OK")
</pallas_src>

<mosaic_0001>
module attributes {stable_mosaic.version = 11 : i64} {
  func.func @_dlow_kernel(%arg0: i32, %arg1: memref<8x128xf32, #tpu.memory_space<vmem>>, %arg2: memref<128x128xf32, #tpu.memory_space<vmem>>, %arg3: memref<1x128xf32, #tpu.memory_space<vmem>>, %arg4: memref<128x128xf32, #tpu.memory_space<vmem>>, %arg5: memref<1x128xf32, #tpu.memory_space<vmem>>, %arg6: memref<128x256xf32, #tpu.memory_space<vmem>>, %arg7: memref<1x256xf32, #tpu.memory_space<vmem>>, %arg8: memref<8x256xf32, #tpu.memory_space<vmem>>) attributes {dimension_semantics = [#tpu.dimension_semantics<parallel>], iteration_bounds = array<i64: 1>, scalar_prefetch = 0 : i64, scratch_operands = 0 : i64, tpu.core_type = #tpu.core_type<tc>, window_params = [{transform_indices = @transform_0, window_bounds = array<i64: 8, 128>}, {pipeline_mode = #tpu.pipeline_mode<synchronous>, transform_indices = @transform_1, window_bounds = array<i64: 128, 128>}, {pipeline_mode = #tpu.pipeline_mode<synchronous>, transform_indices = @transform_2, window_bounds = array<i64: 1, 128>}, {pipeline_mode = #tpu.pipeline_mode<synchronous>, transform_indices = @transform_3, window_bounds = array<i64: 128, 128>}, {pipeline_mode = #tpu.pipeline_mode<synchronous>, transform_indices = @transform_4, window_bounds = array<i64: 1, 128>}, {pipeline_mode = #tpu.pipeline_mode<synchronous>, transform_indices = @transform_5, window_bounds = array<i64: 128, 256>}, {pipeline_mode = #tpu.pipeline_mode<synchronous>, transform_indices = @transform_6, window_bounds = array<i64: 1, 256>}, {transform_indices = @transform_7, window_bounds = array<i64: 8, 256>}]} {
    %c0 = arith.constant 0 : index
    %c0_0 = arith.constant 0 : index
    %0 = vector.load %arg1[%c0, %c0_0] : memref<8x128xf32, #tpu.memory_space<vmem>>, vector<8x128xf32>
    %c0_1 = arith.constant 0 : index
    %c0_2 = arith.constant 0 : index
    %1 = vector.load %arg2[%c0_1, %c0_2] : memref<128x128xf32, #tpu.memory_space<vmem>>, vector<128x128xf32>
    %cst = arith.constant dense<0.000000e+00> : vector<8x128xf32>
    %2 = tpu.matmul %0, %1, %cst {dimension_numbers = #tpu.dot_dimension_numbers<[1], [0], [0], [1], [0, 0, 1, 1], [], []>} : vector<8x128xf32>, vector<128x128xf32>, vector<8x128xf32> -> vector<8x128xf32>
    %c0_3 = arith.constant 0 : index
    %c0_4 = arith.constant 0 : index
    %3 = vector.load %arg3[%c0_3, %c0_4] : memref<1x128xf32, #tpu.memory_space<vmem>>, vector<1x128xf32>
    %4 = vector.broadcast %3 : vector<1x128xf32> to vector<8x128xf32>
    %5 = arith.addf %2, %4 : vector<8x128xf32>
    %6 = math.tanh %5 : vector<8x128xf32>
    %c0_5 = arith.constant 0 : index
    %c0_6 = arith.constant 0 : index
    %7 = vector.load %arg4[%c0_5, %c0_6] : memref<128x128xf32, #tpu.memory_space<vmem>>, vector<128x128xf32>
    %cst_7 = arith.constant dense<0.000000e+00> : vector<8x128xf32>
    %8 = tpu.matmul %6, %7, %cst_7 {dimension_numbers = #tpu.dot_dimension_numbers<[1], [0], [0], [1], [0, 0, 1, 1], [], []>} : vector<8x128xf32>, vector<128x128xf32>, vector<8x128xf32> -> vector<8x128xf32>
    %c0_8 = arith.constant 0 : index
    %c0_9 = arith.constant 0 : index
    %9 = vector.load %arg5[%c0_8, %c0_9] : memref<1x128xf32, #tpu.memory_space<vmem>>, vector<1x128xf32>
    %10 = vector.broadcast %9 : vector<1x128xf32> to vector<8x128xf32>
    %11 = arith.addf %8, %10 : vector<8x128xf32>
    %12 = math.tanh %11 : vector<8x128xf32>
    %c0_10 = arith.constant 0 : index
    %c0_11 = arith.constant 0 : index
    %13 = vector.load %arg6[%c0_10, %c0_11] : memref<128x256xf32, #tpu.memory_space<vmem>>, vector<128x256xf32>
    %cst_12 = arith.constant dense<0.000000e+00> : vector<8x256xf32>
    %14 = tpu.matmul %12, %13, %cst_12 {dimension_numbers = #tpu.dot_dimension_numbers<[1], [0], [0], [1], [0, 0, 1, 1], [], []>} : vector<8x128xf32>, vector<128x256xf32>, vector<8x256xf32> -> vector<8x256xf32>
    %c0_13 = arith.constant 0 : index
    %c0_14 = arith.constant 0 : index
    %15 = vector.load %arg7[%c0_13, %c0_14] : memref<1x256xf32, #tpu.memory_space<vmem>>, vector<1x256xf32>
    %16 = vector.broadcast %15 : vector<1x256xf32> to vector<8x256xf32>
    %17 = arith.addf %14, %16 : vector<8x256xf32>
    %c0_15 = arith.constant 0 : index
    %c0_16 = arith.constant 0 : index
    %18 = vector.load %arg8[%c0_15, %c0_16] : memref<8x256xf32, #tpu.memory_space<vmem>>, vector<8x256xf32>
    tpu.vector_store %arg8[%c0_15, %c0_16], %17 {strides = array<i32>} : memref<8x256xf32, #tpu.memory_space<vmem>>, vector<8x256xf32>,
    return
  }
  func.func @transform_0(%arg0: i32) -> (i32, i32) {
    %c0_i32 = arith.constant 0 : i32
    %c0_i32_0 = arith.constant 0 : i32
    return %arg0, %c0_i32 : i32, i32
  }
  func.func @transform_1(%arg0: i32) -> (i32, i32) {
    %c0_i32 = arith.constant 0 : i32
    %c0_i32_0 = arith.constant 0 : i32
    %c0_i32_1 = arith.constant 0 : i32
    return %c0_i32, %c0_i32_0 : i32, i32
  }
  func.func @transform_2(%arg0: i32) -> (i32, i32) {
    %c0_i32 = arith.constant 0 : i32
    %c0_i32_0 = arith.constant 0 : i32
    %c0_i32_1 = arith.constant 0 : i32
    return %c0_i32, %c0_i32_0 : i32, i32
  }
  func.func @transform_3(%arg0: i32) -> (i32, i32) {
    %c0_i32 = arith.constant 0 : i32
    %c0_i32_0 = arith.constant 0 : i32
    %c0_i32_1 = arith.constant 0 : i32
    return %c0_i32, %c0_i32_0 : i32, i32
  }
  func.func @transform_4(%arg0: i32) -> (i32, i32) {
    %c0_i32 = arith.constant 0 : i32
    %c0_i32_0 = arith.constant 0 : i32
    %c0_i32_1 = arith.constant 0 : i32
    return %c0_i32, %c0_i32_0 : i32, i32
  }
  func.func @transform_5(%arg0: i32) -> (i32, i32) {
    %c0_i32 = arith.constant 0 : i32
    %c0_i32_0 = arith.constant 0 : i32
    %c0_i32_1 = arith.constant 0 : i32
    return %c0_i32, %c0_i32_0 : i32, i32
  }
  func.func @transform_6(%arg0: i32) -> (i32, i32) {
    %c0_i32 = arith.constant 0 : i32
    %c0_i32_0 = arith.constant 0 : i32
    %c0_i32_1 = arith.constant 0 : i32
    return %c0_i32, %c0_i32_0 : i32, i32
  }
  func.func @transform_7(%arg0: i32) -> (i32, i32) {
    %c0_i32 = arith.constant 0 : i32
    %c0_i32_0 = arith.constant 0 : i32
    return %arg0, %c0_i32 : i32, i32
  }
}

</mosaic_0001>

<bundles_post_ra>
// kernel: dlow_forward.1
= control target key start
LH: loop header
LB: loop body
LE: loop exit
PB: predicated region body
PF: predicated region fallthrough
CT: control target
= control target key end

     0   :  { %12 = vsyncpa [#allocation3], 0  ;;  %s405_s0 = inlined_call_operand.vmem [shape: f32[8,128], index: 0, kind: input, shape index: {}]   ;;  %s406_s1 = inlined_call_operand.hbm [shape: f32[128,128], index: 1, kind: input, shape index: {}]   ;;  %s407_s2 = inlined_call_operand.vmem [shape: f32[1,128], index: 2, kind: input, shape index: {}]   ;;  %s408_s3 = inlined_call_operand.hbm [shape: f32[128,128], index: 3, kind: input, shape index: {}]   ;;  %s409_s4 = inlined_call_operand.vmem [shape: f32[1,128], index: 4, kind: input, shape index: {}]   ;;  %s410_s5 = inlined_call_operand.hbm [shape: f32[128,256], index: 5, kind: input, shape index: {}]   ;;  %s411_s6 = inlined_call_operand.vmem [shape: f32[1,256], index: 6, kind: input, shape index: {}]   ;;  %s412_s7 = inlined_call_operand.vmem [shape: f32[8,256], index: 7, kind: output, shape index: {}]  }
   0x1   :  { %13 = vsyncpa [#allocation5], 0  ;;  %s35_s26 = sshll.u32 %s408_s3, 4  ;;  %s331_s27 = smov [#allocation4]   ;;  %s36_s26 = int_to_ptr.hbm [resolvable:$true] %s35_s26 }
   0x2   :  { %s37_s28 = sshll.u32 %s331_s27, 4  ;;  %s20_s8 = sshll.u32 %s406_s1, 4  ;;  %s38_s28 = int_to_ptr.vmem [resolvable:$true] %s37_s28  ;;  %s21_s8 = int_to_ptr.hbm [resolvable:$true] %s20_s8 }
   0x3   :  { %s332_s9 = smov 128   ;;  %s333_s10 = smov 8  }
   0x4   :  { %43 = dma.hbm_to_vmem [thread:$0]  %s36_s26, 2048, %s38_s28, [#allocation5], %s332_s9, %s332_s9, %s333_s10  }
   0x5   :  { %s334_s11 = smov [#allocation2]   ;;  %s50_s15 = sshll.u32 %s410_s5, 4  ;;  %s51_s15 = int_to_ptr.hbm [resolvable:$true] %s50_s15 }
   0x6   :  { %s22_s12 = sshll.u32 %s334_s11, 4  ;;  %s335_s3 = smov [#allocation6]   ;;  %s23_s12 = int_to_ptr.vmem [resolvable:$true] %s22_s12 }
   0x7   :  { %28 = dma.hbm_to_vmem [thread:$0]  %s21_s8, 2048, %s23_s12, [#allocation3], %s332_s9, %s332_s9, %s333_s10  }
   0x8   :  { %s52_s16 = sshll.u32 %s335_s3, 4  ;;  %s336_s17 = smov 256   ;;  %s53_s16 = int_to_ptr.vmem [resolvable:$true] %s52_s16 }
   0x9   :  { %s337_s18 = smov 16  }
   0xa   :  { %58 = dma.hbm_to_vmem [thread:$0]  %s51_s15, 4096, %s53_s16, [#allocation5], %s336_s17, %s336_s17, %s337_s18  }
   0xb   :  { %327 = dma.done.wait [#allocation3], 2048  }
   0xc   :  { %328 = vsyncadd [#allocation3], 4294965248 }
   0xd   :  { %329 = dma.done.wait [#allocation5], 6144  }
   0xe   :  { %330 = vsyncadd [#allocation5], 4294961152  ;;  %v89_v0 = vld [vmem:[#allocation2 + $0x78] sm:$0xff]  ;;  %v88_v1 = vld [vmem:[#allocation2 + $0x70] sm:$0xff] }
   0xf   :  { %94 = vmatpush.msra.mxu0 %v89_v0  ;;  %v87_v2 = vld [vmem:[#allocation2 + $0x68] sm:$0xff]  ;;  %v86_v3 = vld [vmem:[#allocation2 + $0x60] sm:$0xff]  ;;  %v130_v4 = vld [vmem:[#allocation4 + $0x78] sm:$0xff] }
  0x10   :  { %v85_v5 = vld [vmem:[#allocation2 + $0x58] sm:$0xff]  ;;  %135 = vmatpush.msra.mxu1 %v130_v4  ;;  %v129_v6 = vld [vmem:[#allocation4 + $0x70] sm:$0xff]  ;;  %v128_v7 = vld [vmem:[#allocation4 + $0x68] sm:$0xff] }
  0x11   :  { %95 = vmatpush.msra.mxu0 %v88_v1  ;;  %v84_v8 = vld [vmem:[#allocation2 + $0x50] sm:$0xff]  ;;  %v127_v9 = vld [vmem:[#allocation4 + $0x60] sm:$0xff]  ;;  %v83_v10 = vld [vmem:[#allocation2 + $0x48] sm:$0xff] }
  0x12   :  { %136 = vmatpush.msra.mxu1 %v129_v6  ;;  %v126_v11 = vld [vmem:[#allocation4 + $0x58] sm:$0xff]  ;;  %v82_v12 = vld [vmem:[#allocation2 + $0x40] sm:$0xff]  ;;  %v125_v13 = vld [vmem:[#allocation4 + $0x50] sm:$0xff] }
  0x13   :  { %96 = vmatpush.msra.mxu0 %v87_v2  ;;  %v81_v14 = vld [vmem:[#allocation2 + $0x38] sm:$0xff]  ;;  %v124_v15 = vld [vmem:[#allocation4 + $0x48] sm:$0xff]  ;;  %v80_v16 = vld [vmem:[#allocation2 + $0x30] sm:$0xff] }
  0x14   :  { %137 = vmatpush.msra.mxu1 %v128_v7  ;;  %v123_v17 = vld [vmem:[#allocation4 + $0x40] sm:$0xff]  ;;  %v79_v18 = vld [vmem:[#allocation2 + $0x28] sm:$0xff]  ;;  %v122_v19 = vld [vmem:[#allocation4 + $0x38] sm:$0xff] }
  0x15   :  { %97 = vmatpush.msra.mxu0 %v86_v3  ;;  %v78_v20 = vld [vmem:[#allocation2 + $0x20] sm:$0xff]  ;;  %v121_v21 = vld [vmem:[#allocation4 + $0x30] sm:$0xff]  ;;  %v77_v22 = vld [vmem:[#allocation2 + $0x18] sm:$0xff] }
  0x16   :  { %138 = vmatpush.msra.mxu1 %v127_v9  ;;  %v120_v23 = vld [vmem:[#allocation4 + $0x28] sm:$0xff]  ;;  %v76_v24 = vld [vmem:[#allocation2 + $0x10] sm:$0xff]  ;;  %v74_v26 = vld [vmem:[#allocation2] sm:$0xff] }
  0x17   :  { %98 = vmatpush.msra.mxu0 %v85_v5  ;;  %v75_v25 = vld [vmem:[#allocation2 + $0x8] sm:$0xff]  ;;  %v73_v27 = vld [vmem:[%s405_s0] sm:$0xff]  ;;  %v118_v29 = vld [vmem:[#allocation4 + $0x18] sm:$0xff] }
  0x18   :  { %139 = vmatpush.msra.mxu1 %v126_v11  ;;  %v119_v28 = vld [vmem:[#allocation4 + $0x20] sm:$0xff]  ;;  %v117_v30 = vld [vmem:[#allocation4 + $0x10] sm:$0xff]  ;;  %v116_v31 = vld [vmem:[#allocation4 + $0x8] sm:$0xff] }
  0x19   :  { %99 = vmatpush.msra.mxu0 %v84_v8  ;;  %v115_v32 = vld [vmem:[#allocation4] sm:$0xff]  ;;  %v186_v33 = vld [vmem:[#allocation6 + $0xf0] sm:$0xff]  ;;  %v187_v34 = vld [vmem:[#allocation6 + $0xf8] sm:$0xff] }
  0x1a   :  { %140 = vmatpush.msra.mxu1 %v125_v13  ;;  %v184_v35 = vld [vmem:[#allocation6 + $0xe0] sm:$0xff]  ;;  %194 = vmatpush.msra.mxu2 %v186_v33  ;;  %v185_v36 = vld [vmem:[#allocation6 + $0xe8] sm:$0xff]  ;;  %v182_v37 = vld [vmem:[#allocation6 + $0xd0] sm:$0xff] }
  0x1b   :  { %100 = vmatpush.msra.mxu0 %v83_v10  ;;  %214 = vmatpush.msra.mxu3 %v187_v34  ;;  %v183_v38 = vld [vmem:[#allocation6 + $0xd8] sm:$0xff]  ;;  %v180_v39 = vld [vmem:[#allocation6 + $0xc0] sm:$0xff]  ;;  %v181_v40 = vld [vmem:[#allocation6 + $0xc8] sm:$0xff] }
  0x1c   :  { %141 = vmatpush.msra.mxu1 %v124_v15  ;;  %195 = vmatpush.msra.mxu2 %v184_v35  ;;  %v178_v41 = vld [vmem:[#allocation6 + $0xb0] sm:$0xff]  ;;  %v179_v42 = vld [vmem:[#allocation6 + $0xb8] sm:$0xff]  ;;  %v176_v43 = vld [vmem:[#allocation6 + $0xa0] sm:$0xff] }
  0x1d   :  { %101 = vmatpush.msra.mxu0 %v82_v12  ;;  %215 = vmatpush.msra.mxu3 %v185_v36  ;;  %v177_v44 = vld [vmem:[#allocation6 + $0xa8] sm:$0xff]  ;;  %v174_v45 = vld [vmem:[#allocation6 + $0x90] sm:$0xff]  ;;  %v175_v46 = vld [vmem:[#allocation6 + $0x98] sm:$0xff] }
  0x1e   :  { %142 = vmatpush.msra.mxu1 %v123_v17  ;;  %196 = vmatpush.msra.mxu2 %v182_v37  ;;  %v172_v47 = vld [vmem:[#allocation6 + $0x80] sm:$0xff]  ;;  %v173_v48 = vld [vmem:[#allocation6 + $0x88] sm:$0xff]  ;;  %v170_v49 = vld [vmem:[#allocation6 + $0x70] sm:$0xff] }
  0x1f   :  { %102 = vmatpush.msra.mxu0 %v81_v14  ;;  %216 = vmatpush.msra.mxu3 %v183_v38  ;;  %v171_v50 = vld [vmem:[#allocation6 + $0x78] sm:$0xff]  ;;  %v168_v51 = vld [vmem:[#allocation6 + $0x60] sm:$0xff]  ;;  %v169_v52 = vld [vmem:[#allocation6 + $0x68] sm:$0xff] }
  0x20   :  { %143 = vmatpush.msra.mxu1 %v122_v19  ;;  %197 = vmatpush.msra.mxu2 %v180_v39  ;;  %v166_v53 = vld [vmem:[#allocation6 + $0x50] sm:$0xff]  ;;  %v167_v54 = vld [vmem:[#allocation6 + $0x58] sm:$0xff]  ;;  %v249_v55 = vld [vmem:[%s407_s2] ss:$0 sm:$0xff] }
  0x21   :  { %103 = vmatpush.msra.mxu0 %v80_v16  ;;  %217 = vmatpush.msra.mxu3 %v181_v40  ;;  %v164_v59 = vld [vmem:[#allocation6 + $0x40] sm:$0xff]  ;;  %v165_v60 = vld [vmem:[#allocation6 + $0x48] sm:$0xff]  ;;  %v162_v61 = vld [vmem:[#allocation6 + $0x30] sm:$0xff] }
  0x22   :  { %144 = vmatpush.msra.mxu1 %v121_v21  ;;  %198 = vmatpush.msra.mxu2 %v178_v41  ;;  %v163_v62 = vld [vmem:[#allocation6 + $0x38] sm:$0xff]  ;;  %v160_v63 = vld [vmem:[#allocation6 + $0x20] sm:$0xff]  ;;  %v161_v0 = vld [vmem:[#allocation6 + $0x28] sm:$0xff] }
  0x23   :  { %104 = vmatpush.msra.mxu0 %v79_v18  ;;  %218 = vmatpush.msra.mxu3 %v179_v42  ;;  %v158_v1 = vld [vmem:[#allocation6 + $0x10] sm:$0xff]  ;;  %v159_v2 = vld [vmem:[#allocation6 + $0x18] sm:$0xff]  ;;  %v156_v3 = vld [vmem:[#allocation6] sm:$0xff] }
  0x24   :  { %145 = vmatpush.msra.mxu1 %v120_v23  ;;  %199 = vmatpush.msra.mxu2 %v176_v43  ;;  %v157_v4 = vld [vmem:[#allocation6 + $0x8] sm:$0xff]  ;;  %v250_v5 = vld [vmem:[%s409_s4] ss:$0 sm:$0xff] }
  0x25   :  { %105 = vmatpush.msra.mxu0 %v78_v20  ;;  %219 = vmatpush.msra.mxu3 %v177_v44  ;;  %v188_v9 = vld [vmem:[%s411_s6] sm:$0x3] }
  0x26   :  { %146 = vmatpush.msra.mxu1 %v119_v28  ;;  %200 = vmatpush.msra.mxu2 %v174_v45  ;;  %v190_v10 = vperm.slane %v188_v9, 0  ;;  %v191_v11 = vperm.slane %v188_v9, 1 }
  0x27   :  { %106 = vmatpush.msra.mxu0 %v77_v22  ;;  %220 = vmatpush.msra.mxu3 %v175_v46 }
  0x28   :  { %147 = vmatpush.msra.mxu1 %v118_v29  ;;  %201 = vmatpush.msra.mxu2 %v172_v47 }
  0x29   :  { %107 = vmatpush.msra.mxu0 %v76_v24  ;;  %221 = vmatpush.msra.mxu3 %v173_v48 }
  0x2a   :  { %148 = vmatpush.msra.mxu1 %v117_v30  ;;  %202 = vmatpush.msra.mxu2 %v170_v49 }
  0x2b   :  { %108 = vmatpush.msra.mxu0 %v75_v25  ;;  %222 = vmatpush.msra.mxu3 %v171_v50 }
  0x2c   :  { %149 = vmatpush.msra.mxu1 %v116_v31  ;;  %203 = vmatpush.msra.mxu2 %v168_v51 }
  0x2d   :  { %109 = vmatpush.msra.mxu0 %v74_v26  ;;  %223 = vmatpush.msra.mxu3 %v169_v52 }
  0x2e   :  { %110 = vmatmul.f32.vlgmr.msra.gmra.mxu0 %v73_v27  ;;  %150 = vmatpush.msra.mxu1 %v115_v32 }
  0x2f   :  { %204 = vmatpush.msra.mxu2 %v166_v53  ;;  %224 = vmatpush.msra.mxu3 %v167_v54 }
  0x31   :  { %205 = vmatpush.msra.mxu2 %v164_v59  ;;  %225 = vmatpush.msra.mxu3 %v165_v60 }
  0x33   :  { %206 = vmatpush.msra.mxu2 %v162_v61  ;;  %226 = vmatpush.msra.mxu3 %v163_v62 }
  0x35   :  { %207 = vmatpush.msra.mxu2 %v160_v63  ;;  %227 = vmatpush.msra.mxu3 %v161_v0 }
  0x37   :  { %208 = vmatpush.msra.mxu2 %v158_v1  ;;  %228 = vmatpush.msra.mxu3 %v159_v2 }
  0x39   :  { %209 = vmatpush.msra.mxu2 %v156_v3  ;;  %229 = vmatpush.msra.mxu3 %v157_v4 }
  0xab   :  { %v111_v56 = vpop.f32.mrf.mxu0 }
  0xac   :  { %v112_v57 = vadd.f32 %v249_v55, %v111_v56 }
  0xae   :  { %251 = vtanh.f32 %v112_v57 }
  0xb4   :  { %v252_v58 = vpop.eup %251 }
  0xb5   :  { %151 = vmatmul.f32.vlgmr.msra.gmra.mxu1 %v252_v58 }
 0x132   :  { %v152_v6 = vpop.f32.mrf.mxu1 }
 0x133   :  { %v153_v7 = vadd.f32 %v250_v5, %v152_v6 }
 0x135   :  { %253 = vtanh.f32 %v153_v7 }
 0x13b   :  { %v254_v8 = vpop.eup %253 }
 0x13c   :  { %210 = vmatmul.f32.vlgmr.msra.gmra.mxu2 %v254_v8  ;;  %230 = vmatmul.f32.vlgmr.msra.gmra.mxu3 %v254_v8 }
 0x1bf   :  { %v211_v12 = vpop.f32.mrf.mxu2  ;;  %v231_v13 = vpop.f32.mrf.mxu3 }
 0x1c0   :  { %v212_v14 = vadd.f32 %v211_v12, %v190_v10  ;;  %v232_v15 = vadd.f32 %v231_v13, %v191_v11 }
 0x1c2   :  { %234 = vst [vmem:[%s412_s7] sm:$0xff] %v212_v14 }
 0x1c3   :  { %235 = vst [vmem:[%s412_s7 + $0x8] sm:$0xff] %v232_v15 }
 0x1c4   :  { %240 = vsyncpa [#allocation3], 1 }
 0x1c5   :  { %241 = vsyncpa [#allocation5], 1 }

</bundles_post_ra>
